<compile_context>
chip_gen: v5e
topology: v5e:2x2
jax: 0.10.0
libtpu: 0.0.40
codegen_flags: <defaults>
</compile_context>

<pallas_src>
import numpy as np
import jax
import jax.numpy as jnp
from jax.experimental import pallas as pl
from jax.experimental.pallas import tpu as pltpu


# -------------------- JPEG constants (match DiffJPEG utils.py) -----------------
_Y_TABLE = np.array(
    [[16, 11, 10, 16, 24, 40, 51, 61],
     [12, 12, 14, 19, 26, 58, 60, 55],
     [14, 13, 16, 24, 40, 57, 69, 56],
     [14, 17, 22, 29, 51, 87, 80, 62],
     [18, 22, 37, 56, 68, 109, 103, 77],
     [24, 35, 55, 64, 81, 104, 113, 92],
     [49, 64, 78, 87, 103, 121, 120, 101],
     [72, 92, 95, 98, 112, 100, 103, 99]], dtype=np.float32).T

_C_TABLE = np.full((8, 8), 99, dtype=np.float32)
_C_TABLE[:4, :4] = np.array(
    [[17, 18, 24, 47], [18, 21, 26, 66],
     [24, 26, 56, 99], [47, 66, 99, 99]], dtype=np.float32).T


def quality_to_factor(quality):
    if quality < 50:
        q = 5000.0 / quality
    else:
        q = 200.0 - quality * 2
    return q / 100.0


# -------------------- host-side operator construction --------------------------
def _cos8():
    """C[u, x] = cos((2x+1) u pi / 16)  (8x8 DCT basis, un-normalized)."""
    u = np.arange(8, dtype=np.float64)[:, None]
    x = np.arange(8, dtype=np.float64)[None, :]
    return np.cos((2.0 * x + 1.0) * u * np.pi / 16.0)


def _blkdiag(m, k):
    n = m.shape[0]
    out = np.zeros((n * k, n * k), dtype=np.float64)
    for i in range(k):
        out[i * n:(i + 1) * n, i * n:(i + 1) * n] = m
    return out


def _pool_pairs(n):
    """(n//2, n): averages adjacent pairs (one axis of the 2x2 avg-pool)."""
    p = np.zeros((n // 2, n), dtype=np.float64)
    i = np.arange(n // 2)
    p[i, 2 * i] = 0.5
    p[i, 2 * i + 1] = 0.5
    return p


def _dup_pairs(n):
    """(n, n//2): duplicates each source element twice (2x nearest upsample)."""
    u = np.zeros((n, n // 2), dtype=np.float64)
    i = np.arange(n // 2)
    u[2 * i, i] = 1.0
    u[2 * i + 1, i] = 1.0
    return u


def _pick_tile_h(h):
    """Largest multiple-of-16 divisor of h, capped at 128 (left-matmul waste)."""
    best = 16
    for d in range(16, min(h, 128) + 1, 16):
        if h % d == 0:
            best = d
    return best


def _pick_tile_w(w):
    """Lane-dense width tile: multiple of 128 (or the full width) dividing w."""
    if w <= 256:
        return w                     # full width: always a legal block dim
    if w % 256 == 0:
        return 256
    if w % 128 == 0:
        return 128
    # TODO(synk): widths > 256 not divisible by 128 fall back to a full-width
    # tile (legal but VMEM-heavy); could pad-to-128-multiple instead.
    return w


def _build_constants(th, tw, factor):
    """All trace-time operators for one (th, tw) tile, as float32 jnp arrays."""
    c = _cos8()
    alpha = np.array([1.0 / np.sqrt(2.0)] + [1.0] * 7)
    aa = np.outer(alpha, alpha)

    # Luma block-diagonal DCT / IDCT operators (left acts on height, right on width).
    dl = _blkdiag(c, th // 8)              # (th, th)   coeff = dl @ (y-128) @ dr
    dr = _blkdiag(c.T, tw // 8)            # (tw, tw)
    il = _blkdiag(c.T, th // 8)            # (th, th)   y'   = il @ m @ ir + 128
    ir = _blkdiag(c, tw // 8)              # (tw, tw)

    # Chroma operators with 2x2 avg-pool (compress) / 2x nearest upsample
    # (decompress) folded straight into the half-resolution DCT / IDCT.
    pdl = _blkdiag(c, th // 16) @ _pool_pairs(th)          # (th/2, th)
    pdr = _pool_pairs(tw).T @ _blkdiag(c.T, tw // 16)      # (tw, tw/2)
    pul = _dup_pairs(th) @ _blkdiag(c.T, th // 16)         # (th, th/2)
    pur = _blkdiag(c, tw // 16) @ _dup_pairs(tw).T         # (tw/2, tw)

    def quant_maps(table, rows, cols):
        k1 = (0.25 * aa) / (table.astype(np.float64) * factor)   # DCT scale / (q*f)
        k2 = (table.astype(np.float64) * factor) * aa * 0.25      # dequant * idct scale
        reps = (rows // 8, cols // 8)
        return np.tile(k1, reps), np.tile(k2, reps)

    k1y, k2y = quant_maps(_Y_TABLE, th, tw)            # (th, tw)
    k1c, k2c = quant_maps(_C_TABLE, th // 2, tw // 2)   # (th/2, tw/2)

    mats = [dl, il, dr, ir, pdl, pdr, pul, pur, k1y, k2y, k1c, k2c]
    return [jnp.asarray(m.astype(np.float32)) for m in mats]


# -------------------- the fused Pallas kernel -----------------------------------
def _diffjpeg_kernel(x_ref, dl_ref, il_ref, dr_ref, ir_ref,
                     pdl_ref, pdr_ref, pul_ref, pur_ref,
                     k1y_ref, k2y_ref, k1c_ref, k2c_ref, o_ref):
    # x_ref: (1, 3, TH, TW) NCHW tile, RGB in [0, 1].
    r = x_ref[0, 0] * 255.0
    g = x_ref[0, 1] * 255.0
    b = x_ref[0, 2] * 255.0

    # RGB -> YCbCr (JPEG).  Chroma is kept zero-centered: the +128 shift cancels
    # against the -128 inside dct_8x8 because the 2x2 avg-pool preserves constants,
    # and the decoder subtracts it again before YCbCr -> RGB.
    y = 0.299 * r + 0.587 * g + 0.114 * b
    cb = -0.168736 * r - 0.331264 * g + 0.5 * b
    cr = 0.5 * r - 0.418688 * g - 0.081312 * b

    def dot(a, b2):
        return jnp.dot(a, b2, preferred_element_type=jnp.float32)

    def quant_dequant(cf, k1, k2):
        cf = cf * k1                      # -> quantized JPEG coefficients
        rf = jnp.round(cf)
        cf = rf + (cf - rf) ** 3          # diff_round (differentiable rounding)
        return cf * k2                    # dequantize * idct scale

    # ---- luma: 8x8 DCT -> quantize -> dequantize -> IDCT (block-diag matmuls) ----
    m = quant_dequant(dot(dot(dl_ref[...], y - 128.0), dr_ref[...]),
                      k1y_ref[...], k2y_ref[...])
    y_out = dot(dot(il_ref[...], m), ir_ref[...]) + 128.0

    # ---- chroma: (pool+DCT) -> quantize -> dequantize -> (IDCT+upsample) ----------
    def chroma(cp):
        mc = quant_dequant(dot(dot(pdl_ref[...], cp), pdr_ref[...]),
                           k1c_ref[...], k2c_ref[...])
        return dot(dot(pul_ref[...], mc), pur_ref[...])

    cb_u = chroma(cb)
    cr_u = chroma(cr)

    # ---- YCbCr -> RGB, clamp to [0, 255], back to [0, 1] ---------------------------
    r_o = y_out + 1.402 * cr_u
    g_o = y_out - 0.344136 * cb_u - 0.714136 * cr_u
    b_o = y_out + 1.772 * cb_u
    inv255 = jnp.float32(1.0 / 255.0)
    o_ref[0, 0] = jnp.clip(r_o, 0.0, 255.0) * inv255
    o_ref[0, 1] = jnp.clip(g_o, 0.0, 255.0) * inv255
    o_ref[0, 2] = jnp.clip(b_o, 0.0, 255.0) * inv255


# -------------------- public entry point -----------------------------------------
def diff_jpeg_forward(x, quality=80):
    """DiffJPEG(height, width, differentiable=True, subsample=True, quality).forward(x)."""
    n, c, h, w = x.shape
    assert c == 3 and h % 16 == 0 and w % 16 == 0
    factor = quality_to_factor(quality)
    if factor <= 0.0:
        factor = 1e-6   # guard quality == 100 (the PyTorch reference divides by zero there)

    th = _pick_tile_h(h)
    tw = _pick_tile_w(w)
    consts = _build_constants(th, tw, float(factor))

    grid = (n, h // th, w // tw)
    img_spec = pl.BlockSpec((1, 3, th, tw), lambda bi, ti, tj: (bi, 0, ti, tj))
    const_specs = [pl.BlockSpec(m.shape, lambda bi, ti, tj: (0, 0)) for m in consts]

    return pl.pallas_call(
        _diffjpeg_kernel,
        out_shape=jax.ShapeDtypeStruct((n, 3, h, w), jnp.float32),
        grid=grid,
        in_specs=[img_spec] + const_specs,
        out_specs=img_spec,
        compiler_params=pltpu.CompilerParams(
            dimension_semantics=("parallel", "parallel", "parallel"),
            vmem_limit_bytes=32 * 1024 * 1024),
    )(x.astype(jnp.float32), *consts)


if __name__ == "__main__":
    key = jax.random.PRNGKey(0)
    x = jax.random.uniform(key, (2, 3, 16, 16), dtype=jnp.float32)  # N,C,H,W in [0,1]
    out = jax.jit(diff_jpeg_forward)(x)
    jax.block_until_ready(out)
    assert out.shape == x.shape and out.dtype == jnp.float32
    assert bool(jnp.all(jnp.isfinite(out)))
    assert bool(jnp.all((out >= 0.0) & (out <= 1.0)))
    print("KERNEL_OK")
</pallas_src>

<mosaic_0001>
module attributes {stable_mosaic.version = 11 : i64} {
  func.func @_diffjpeg_kernel(%arg0: i32, %arg1: i32, %arg2: i32, %arg3: memref<1x3x16x16xf32, #tpu.memory_space<vmem>>, %arg4: memref<16x16xf32, #tpu.memory_space<vmem>>, %arg5: memref<16x16xf32, #tpu.memory_space<vmem>>, %arg6: memref<16x16xf32, #tpu.memory_space<vmem>>, %arg7: memref<16x16xf32, #tpu.memory_space<vmem>>, %arg8: memref<8x16xf32, #tpu.memory_space<vmem>>, %arg9: memref<16x8xf32, #tpu.memory_space<vmem>>, %arg10: memref<16x8xf32, #tpu.memory_space<vmem>>, %arg11: memref<8x16xf32, #tpu.memory_space<vmem>>, %arg12: memref<16x16xf32, #tpu.memory_space<vmem>>, %arg13: memref<16x16xf32, #tpu.memory_space<vmem>>, %arg14: memref<8x8xf32, #tpu.memory_space<vmem>>, %arg15: memref<8x8xf32, #tpu.memory_space<vmem>>, %arg16: memref<1x3x16x16xf32, #tpu.memory_space<vmem>>) attributes {dimension_semantics = [#tpu.dimension_semantics<parallel>, #tpu.dimension_semantics<parallel>, #tpu.dimension_semantics<parallel>], iteration_bounds = array<i64: 2, 1, 1>, scalar_prefetch = 0 : i64, scratch_operands = 0 : i64, tpu.core_type = #tpu.core_type<tc>, window_params = [{transform_indices = @transform_0, window_bounds = array<i64: 1, 3, 16, 16>}, {pipeline_mode = #tpu.pipeline_mode<synchronous>, transform_indices = @transform_1, window_bounds = array<i64: 16, 16>}, {pipeline_mode = #tpu.pipeline_mode<synchronous>, transform_indices = @transform_2, window_bounds = array<i64: 16, 16>}, {pipeline_mode = #tpu.pipeline_mode<synchronous>, transform_indices = @transform_3, window_bounds = array<i64: 16, 16>}, {pipeline_mode = #tpu.pipeline_mode<synchronous>, transform_indices = @transform_4, window_bounds = array<i64: 16, 16>}, {pipeline_mode = #tpu.pipeline_mode<synchronous>, transform_indices = @transform_5, window_bounds = array<i64: 8, 16>}, {pipeline_mode = #tpu.pipeline_mode<synchronous>, transform_indices = @transform_6, window_bounds = array<i64: 16, 8>}, {pipeline_mode = #tpu.pipeline_mode<synchronous>, transform_indices = @transform_7, window_bounds = array<i64: 16, 8>}, {pipeline_mode = #tpu.pipeline_mode<synchronous>, transform_indices = @transform_8, window_bounds = array<i64: 8, 16>}, {pipeline_mode = #tpu.pipeline_mode<synchronous>, transform_indices = @transform_9, window_bounds = array<i64: 16, 16>}, {pipeline_mode = #tpu.pipeline_mode<synchronous>, transform_indices = @transform_10, window_bounds = array<i64: 16, 16>}, {pipeline_mode = #tpu.pipeline_mode<synchronous>, transform_indices = @transform_11, window_bounds = array<i64: 8, 8>}, {pipeline_mode = #tpu.pipeline_mode<synchronous>, transform_indices = @transform_12, window_bounds = array<i64: 8, 8>}, {transform_indices = @transform_13, window_bounds = array<i64: 1, 3, 16, 16>}]} {
    %c0 = arith.constant 0 : index
    %c0_0 = arith.constant 0 : index
    %c0_1 = arith.constant 0 : index
    %c0_2 = arith.constant 0 : index
    %0 = vector.load %arg3[%c0, %c0_0, %c0_1, %c0_2] : memref<1x3x16x16xf32, #tpu.memory_space<vmem>>, vector<1x1x16x16xf32>
    %1 = vector.shape_cast %0 : vector<1x1x16x16xf32> to vector<16x16xf32>
    %cst = arith.constant 2.550000e+02 : f32
    %2 = vector.broadcast %cst : f32 to vector<16x16xf32>
    %3 = arith.mulf %1, %2 : vector<16x16xf32>
    %c0_3 = arith.constant 0 : index
    %c1 = arith.constant 1 : index
    %c0_4 = arith.constant 0 : index
    %c0_5 = arith.constant 0 : index
    %4 = vector.load %arg3[%c0_3, %c1, %c0_4, %c0_5] : memref<1x3x16x16xf32, #tpu.memory_space<vmem>>, vector<1x1x16x16xf32>
    %5 = vector.shape_cast %4 : vector<1x1x16x16xf32> to vector<16x16xf32>
    %cst_6 = arith.constant 2.550000e+02 : f32
    %6 = vector.broadcast %cst_6 : f32 to vector<16x16xf32>
    %7 = arith.mulf %5, %6 : vector<16x16xf32>
    %c0_7 = arith.constant 0 : index
    %c2 = arith.constant 2 : index
    %c0_8 = arith.constant 0 : index
    %c0_9 = arith.constant 0 : index
    %8 = vector.load %arg3[%c0_7, %c2, %c0_8, %c0_9] : memref<1x3x16x16xf32, #tpu.memory_space<vmem>>, vector<1x1x16x16xf32>
    %9 = vector.shape_cast %8 : vector<1x1x16x16xf32> to vector<16x16xf32>
    %cst_10 = arith.constant 2.550000e+02 : f32
    %10 = vector.broadcast %cst_10 : f32 to vector<16x16xf32>
    %11 = arith.mulf %9, %10 : vector<16x16xf32>
    %cst_11 = arith.constant 2.990000e-01 : f32
    %12 = vector.broadcast %cst_11 : f32 to vector<16x16xf32>
    %13 = arith.mulf %12, %3 : vector<16x16xf32>
    %cst_12 = arith.constant 5.870000e-01 : f32
    %14 = vector.broadcast %cst_12 : f32 to vector<16x16xf32>
    %15 = arith.mulf %14, %7 : vector<16x16xf32>
    %16 = arith.addf %13, %15 : vector<16x16xf32>
    %cst_13 = arith.constant 1.140000e-01 : f32
    %17 = vector.broadcast %cst_13 : f32 to vector<16x16xf32>
    %18 = arith.mulf %17, %11 : vector<16x16xf32>
    %19 = arith.addf %16, %18 : vector<16x16xf32>
    %cst_14 = arith.constant -1.687360e-01 : f32
    %20 = vector.broadcast %cst_14 : f32 to vector<16x16xf32>
    %21 = arith.mulf %20, %3 : vector<16x16xf32>
    %cst_15 = arith.constant 3.312640e-01 : f32
    %22 = vector.broadcast %cst_15 : f32 to vector<16x16xf32>
    %23 = arith.mulf %22, %7 : vector<16x16xf32>
    %24 = arith.subf %21, %23 : vector<16x16xf32>
    %cst_16 = arith.constant 5.000000e-01 : f32
    %25 = vector.broadcast %cst_16 : f32 to vector<16x16xf32>
    %26 = arith.mulf %25, %11 : vector<16x16xf32>
    %27 = arith.addf %24, %26 : vector<16x16xf32>
    %cst_17 = arith.constant 5.000000e-01 : f32
    %28 = vector.broadcast %cst_17 : f32 to vector<16x16xf32>
    %29 = arith.mulf %28, %3 : vector<16x16xf32>
    %cst_18 = arith.constant 4.186880e-01 : f32
    %30 = vector.broadcast %cst_18 : f32 to vector<16x16xf32>
    %31 = arith.mulf %30, %7 : vector<16x16xf32>
    %32 = arith.subf %29, %31 : vector<16x16xf32>
    %cst_19 = arith.constant 8.131200e-02 : f32
    %33 = vector.broadcast %cst_19 : f32 to vector<16x16xf32>
    %34 = arith.mulf %33, %11 : vector<16x16xf32>
    %35 = arith.subf %32, %34 : vector<16x16xf32>
    %c0_20 = arith.constant 0 : index
    %c0_21 = arith.constant 0 : index
    %36 = vector.load %arg4[%c0_20, %c0_21] : memref<16x16xf32, #tpu.memory_space<vmem>>, vector<16x16xf32>
    %cst_22 = arith.constant 1.280000e+02 : f32
    %37 = vector.broadcast %cst_22 : f32 to vector<16x16xf32>
    %38 = arith.subf %19, %37 : vector<16x16xf32>
    %cst_23 = arith.constant dense<0.000000e+00> : vector<16x16xf32>
    %39 = tpu.matmul %36, %38, %cst_23 {dimension_numbers = #tpu.dot_dimension_numbers<[1], [0], [0], [1], [0, 0, 1, 1], [], []>} : vector<16x16xf32>, vector<16x16xf32>, vector<16x16xf32> -> vector<16x16xf32>
    %c0_24 = arith.constant 0 : index
    %c0_25 = arith.constant 0 : index
    %40 = vector.load %arg6[%c0_24, %c0_25] : memref<16x16xf32, #tpu.memory_space<vmem>>, vector<16x16xf32>
    %cst_26 = arith.constant dense<0.000000e+00> : vector<16x16xf32>
    %41 = tpu.matmul %39, %40, %cst_26 {dimension_numbers = #tpu.dot_dimension_numbers<[1], [0], [0], [1], [0, 0, 1, 1], [], []>} : vector<16x16xf32>, vector<16x16xf32>, vector<16x16xf32> -> vector<16x16xf32>
    %c0_27 = arith.constant 0 : index
    %c0_28 = arith.constant 0 : index
    %42 = vector.load %arg12[%c0_27, %c0_28] : memref<16x16xf32, #tpu.memory_space<vmem>>, vector<16x16xf32>
    %c0_29 = arith.constant 0 : index
    %c0_30 = arith.constant 0 : index
    %43 = vector.load %arg13[%c0_29, %c0_30] : memref<16x16xf32, #tpu.memory_space<vmem>>, vector<16x16xf32>
    %44 = arith.mulf %41, %42 : vector<16x16xf32>
    %45 = math.roundeven %44 : vector<16x16xf32>
    %46 = arith.subf %44, %45 : vector<16x16xf32>
    %47 = arith.mulf %46, %46 : vector<16x16xf32>
    %48 = arith.mulf %46, %47 : vector<16x16xf32>
    %49 = arith.addf %45, %48 : vector<16x16xf32>
    %50 = arith.mulf %49, %43 : vector<16x16xf32>
    %c0_31 = arith.constant 0 : index
    %c0_32 = arith.constant 0 : index
    %51 = vector.load %arg5[%c0_31, %c0_32] : memref<16x16xf32, #tpu.memory_space<vmem>>, vector<16x16xf32>
    %cst_33 = arith.constant dense<0.000000e+00> : vector<16x16xf32>
    %52 = tpu.matmul %51, %50, %cst_33 {dimension_numbers = #tpu.dot_dimension_numbers<[1], [0], [0], [1], [0, 0, 1, 1], [], []>} : vector<16x16xf32>, vector<16x16xf32>, vector<16x16xf32> -> vector<16x16xf32>
    %c0_34 = arith.constant 0 : index
    %c0_35 = arith.constant 0 : index
    %53 = vector.load %arg7[%c0_34, %c0_35] : memref<16x16xf32, #tpu.memory_space<vmem>>, vector<16x16xf32>
    %cst_36 = arith.constant dense<0.000000e+00> : vector<16x16xf32>
    %54 = tpu.matmul %52, %53, %cst_36 {dimension_numbers = #tpu.dot_dimension_numbers<[1], [0], [0], [1], [0, 0, 1, 1], [], []>} : vector<16x16xf32>, vector<16x16xf32>, vector<16x16xf32> -> vector<16x16xf32>
    %cst_37 = arith.constant 1.280000e+02 : f32
    %55 = vector.broadcast %cst_37 : f32 to vector<16x16xf32>
    %56 = arith.addf %54, %55 : vector<16x16xf32>
    %c0_38 = arith.constant 0 : index
    %c0_39 = arith.constant 0 : index
    %57 = vector.load %arg8[%c0_38, %c0_39] : memref<8x16xf32, #tpu.memory_space<vmem>>, vector<8x16xf32>
    %cst_40 = arith.constant dense<0.000000e+00> : vector<8x16xf32>
    %58 = tpu.matmul %57, %27, %cst_40 {dimension_numbers = #tpu.dot_dimension_numbers<[1], [0], [0], [1], [0, 0, 1, 1], [], []>} : vector<8x16xf32>, vector<16x16xf32>, vector<8x16xf32> -> vector<8x16xf32>
    %c0_41 = arith.constant 0 : index
    %c0_42 = arith.constant 0 : index
    %59 = vector.load %arg9[%c0_41, %c0_42] : memref<16x8xf32, #tpu.memory_space<vmem>>, vector<16x8xf32>
    %cst_43 = arith.constant dense<0.000000e+00> : vector<8x8xf32>
    %60 = tpu.matmul %58, %59, %cst_43 {dimension_numbers = #tpu.dot_dimension_numbers<[1], [0], [0], [1], [0, 0, 1, 1], [], []>} : vector<8x16xf32>, vector<16x8xf32>, vector<8x8xf32> -> vector<8x8xf32>
    %c0_44 = arith.constant 0 : index
    %c0_45 = arith.constant 0 : index
    %61 = vector.load %arg14[%c0_44, %c0_45] : memref<8x8xf32, #tpu.memory_space<vmem>>, vector<8x8xf32>
    %c0_46 = arith.constant 0 : index
    %c0_47 = arith.constant 0 : index
    %62 = vector.load %arg15[%c0_46, %c0_47] : memref<8x8xf32, #tpu.memory_space<vmem>>, vector<8x8xf32>
    %63 = arith.mulf %60, %61 : vector<8x8xf32>
    %64 = math.roundeven %63 : vector<8x8xf32>
    %65 = arith.subf %63, %64 : vector<8x8xf32>
    %66 = arith.mulf %65, %65 : vector<8x8xf32>
    %67 = arith.mulf %65, %66 : vector<8x8xf32>
    %68 = arith.addf %64, %67 : vector<8x8xf32>
    %69 = arith.mulf %68, %62 : vector<8x8xf32>
    %c0_48 = arith.constant 0 : index
    %c0_49 = arith.constant 0 : index
    %70 = vector.load %arg10[%c0_48, %c0_49] : memref<16x8xf32, #tpu.memory_space<vmem>>, vector<16x8xf32>
    %cst_50 = arith.constant dense<0.000000e+00> : vector<16x8xf32>
    %71 = tpu.matmul %70, %69, %cst_50 {dimension_numbers = #tpu.dot_dimension_numbers<[1], [0], [0], [1], [0, 0, 1, 1], [], []>} : vector<16x8xf32>, vector<8x8xf32>, vector<16x8xf32> -> vector<16x8xf32>
    %c0_51 = arith.constant 0 : index
    %c0_52 = arith.constant 0 : index
    %72 = vector.load %arg11[%c0_51, %c0_52] : memref<8x16xf32, #tpu.memory_space<vmem>>, vector<8x16xf32>
    %cst_53 = arith.constant dense<0.000000e+00> : vector<16x16xf32>
    %73 = tpu.matmul %71, %72, %cst_53 {dimension_numbers = #tpu.dot_dimension_numbers<[1], [0], [0], [1], [0, 0, 1, 1], [], []>} : vector<16x8xf32>, vector<8x16xf32>, vector<16x16xf32> -> vector<16x16xf32>
    %c0_54 = arith.constant 0 : index
    %c0_55 = arith.constant 0 : index
    %74 = vector.load %arg8[%c0_54, %c0_55] : memref<8x16xf32, #tpu.memory_space<vmem>>, vector<8x16xf32>
    %cst_56 = arith.constant dense<0.000000e+00> : vector<8x16xf32>
    %75 = tpu.matmul %74, %35, %cst_56 {dimension_numbers = #tpu.dot_dimension_numbers<[1], [0], [0], [1], [0, 0, 1, 1], [], []>} : vector<8x16xf32>, vector<16x16xf32>, vector<8x16xf32> -> vector<8x16xf32>
    %c0_57 = arith.constant 0 : index
    %c0_58 = arith.constant 0 : index
    %76 = vector.load %arg9[%c0_57, %c0_58] : memref<16x8xf32, #tpu.memory_space<vmem>>, vector<16x8xf32>
    %cst_59 = arith.constant dense<0.000000e+00> : vector<8x8xf32>
    %77 = tpu.matmul %75, %76, %cst_59 {dimension_numbers = #tpu.dot_dimension_numbers<[1], [0], [0], [1], [0, 0, 1, 1], [], []>} : vector<8x16xf32>, vector<16x8xf32>, vector<8x8xf32> -> vector<8x8xf32>
    %c0_60 = arith.constant 0 : index
    %c0_61 = arith.constant 0 : index
    %78 = vector.load %arg14[%c0_60, %c0_61] : memref<8x8xf32, #tpu.memory_space<vmem>>, vector<8x8xf32>
    %c0_62 = arith.constant 0 : index
    %c0_63 = arith.constant 0 : index
    %79 = vector.load %arg15[%c0_62, %c0_63] : memref<8x8xf32, #tpu.memory_space<vmem>>, vector<8x8xf32>
    %80 = arith.mulf %77, %78 : vector<8x8xf32>
    %81 = math.roundeven %80 : vector<8x8xf32>
    %82 = arith.subf %80, %81 : vector<8x8xf32>
    %83 = arith.mulf %82, %82 : vector<8x8xf32>
    %84 = arith.mulf %82, %83 : vector<8x8xf32>
    %85 = arith.addf %81, %84 : vector<8x8xf32>
    %86 = arith.mulf %85, %79 : vector<8x8xf32>
    %c0_64 = arith.constant 0 : index
    %c0_65 = arith.constant 0 : index
    %87 = vector.load %arg10[%c0_64, %c0_65] : memref<16x8xf32, #tpu.memory_space<vmem>>, vector<16x8xf32>
    %cst_66 = arith.constant dense<0.000000e+00> : vector<16x8xf32>
    %88 = tpu.matmul %87, %86, %cst_66 {dimension_numbers = #tpu.dot_dimension_numbers<[1], [0], [0], [1], [0, 0, 1, 1], [], []>} : vector<16x8xf32>, vector<8x8xf32>, vector<16x8xf32> -> vector<16x8xf32>
    %c0_67 = arith.constant 0 : index
    %c0_68 = arith.constant 0 : index
    %89 = vector.load %arg11[%c0_67, %c0_68] : memref<8x16xf32, #tpu.memory_space<vmem>>, vector<8x16xf32>
    %cst_69 = arith.constant dense<0.000000e+00> : vector<16x16xf32>
    %90 = tpu.matmul %88, %89, %cst_69 {dimension_numbers = #tpu.dot_dimension_numbers<[1], [0], [0], [1], [0, 0, 1, 1], [], []>} : vector<16x8xf32>, vector<8x16xf32>, vector<16x16xf32> -> vector<16x16xf32>
    %cst_70 = arith.constant 1.402000e+00 : f32
    %91 = vector.broadcast %cst_70 : f32 to vector<16x16xf32>
    %92 = arith.mulf %91, %90 : vector<16x16xf32>
    %93 = arith.addf %56, %92 : vector<16x16xf32>
    %cst_71 = arith.constant 3.441360e-01 : f32
    %94 = vector.broadcast %cst_71 : f32 to vector<16x16xf32>
    %95 = arith.mulf %94, %73 : vector<16x16xf32>
    %96 = arith.subf %56, %95 : vector<16x16xf32>
    %cst_72 = arith.constant 7.141360e-01 : f32
    %97 = vector.broadcast %cst_72 : f32 to vector<16x16xf32>
    %98 = arith.mulf %97, %90 : vector<16x16xf32>
    %99 = arith.subf %96, %98 : vector<16x16xf32>
    %cst_73 = arith.constant 1.772000e+00 : f32
    %100 = vector.broadcast %cst_73 : f32 to vector<16x16xf32>
    %101 = arith.mulf %100, %73 : vector<16x16xf32>
    %102 = arith.addf %56, %101 : vector<16x16xf32>
    %cst_74 = arith.constant 0.000000e+00 : f32
    %cst_75 = arith.constant 2.550000e+02 : f32
    %103 = vector.broadcast %cst_74 : f32 to vector<16x16xf32>
    %104 = arith.maximumf %103, %93 : vector<16x16xf32>
    %105 = vector.broadcast %cst_75 : f32 to vector<16x16xf32>
    %106 = arith.minimumf %105, %104 : vector<16x16xf32>
    %cst_76 = arith.constant 0.00392156886 : f32
    %107 = vector.broadcast %cst_76 : f32 to vector<16x16xf32>
    %108 = arith.mulf %106, %107 : vector<16x16xf32>
    %c0_77 = arith.constant 0 : index
    %c0_78 = arith.constant 0 : index
    %c0_79 = arith.constant 0 : index
    %c0_80 = arith.constant 0 : index
    %109 = vector.load %arg16[%c0_77, %c0_78, %c0_79, %c0_80] : memref<1x3x16x16xf32, #tpu.memory_space<vmem>>, vector<1x1x16x16xf32>
    %110 = vector.shape_cast %109 : vector<1x1x16x16xf32> to vector<16x16xf32>
    %111 = vector.shape_cast %108 : vector<16x16xf32> to vector<1x1x16x16xf32>
    tpu.vector_store %arg16[%c0_77, %c0_78, %c0_79, %c0_80], %111 {strides = array<i32>} : memref<1x3x16x16xf32, #tpu.memory_space<vmem>>, vector<1x1x16x16xf32>,
    %cst_81 = arith.constant 0.000000e+00 : f32
    %cst_82 = arith.constant 2.550000e+02 : f32
    %112 = vector.broadcast %cst_81 : f32 to vector<16x16xf32>
    %113 = arith.maximumf %112, %99 : vector<16x16xf32>
    %114 = vector.broadcast %cst_82 : f32 to vector<16x16xf32>
    %115 = arith.minimumf %114, %113 : vector<16x16xf32>
    %cst_83 = arith.constant 0.00392156886 : f32
    %116 = vector.broadcast %cst_83 : f32 to vector<16x16xf32>
    %117 = arith.mulf %115, %116 : vector<16x16xf32>
    %c0_84 = arith.constant 0 : index
    %c1_85 = arith.constant 1 : index
    %c0_86 = arith.constant 0 : index
    %c0_87 = arith.constant 0 : index
    %118 = vector.load %arg16[%c0_84, %c1_85, %c0_86, %c0_87] : memref<1x3x16x16xf32, #tpu.memory_space<vmem>>, vector<1x1x16x16xf32>
    %119 = vector.shape_cast %118 : vector<1x1x16x16xf32> to vector<16x16xf32>
    %120 = vector.shape_cast %117 : vector<16x16xf32> to vector<1x1x16x16xf32>
    tpu.vector_store %arg16[%c0_84, %c1_85, %c0_86, %c0_87], %120 {strides = array<i32>} : memref<1x3x16x16xf32, #tpu.memory_space<vmem>>, vector<1x1x16x16xf32>,
    %cst_88 = arith.constant 0.000000e+00 : f32
    %cst_89 = arith.constant 2.550000e+02 : f32
    %121 = vector.broadcast %cst_88 : f32 to vector<16x16xf32>
    %122 = arith.maximumf %121, %102 : vector<16x16xf32>
    %123 = vector.broadcast %cst_89 : f32 to vector<16x16xf32>
    %124 = arith.minimumf %123, %122 : vector<16x16xf32>
    %cst_90 = arith.constant 0.00392156886 : f32
    %125 = vector.broadcast %cst_90 : f32 to vector<16x16xf32>
    %126 = arith.mulf %124, %125 : vector<16x16xf32>
    %c0_91 = arith.constant 0 : index
    %c2_92 = arith.constant 2 : index
    %c0_93 = arith.constant 0 : index
    %c0_94 = arith.constant 0 : index
    %127 = vector.load %arg16[%c0_91, %c2_92, %c0_93, %c0_94] : memref<1x3x16x16xf32, #tpu.memory_space<vmem>>, vector<1x1x16x16xf32>
    %128 = vector.shape_cast %127 : vector<1x1x16x16xf32> to vector<16x16xf32>
    %129 = vector.shape_cast %126 : vector<16x16xf32> to vector<1x1x16x16xf32>
    tpu.vector_store %arg16[%c0_91, %c2_92, %c0_93, %c0_94], %129 {strides = array<i32>} : memref<1x3x16x16xf32, #tpu.memory_space<vmem>>, vector<1x1x16x16xf32>,
    return
  }
  func.func @transform_0(%arg0: i32, %arg1: i32, %arg2: i32) -> (i32, i32, i32, i32) {
    %c0_i32 = arith.constant 0 : i32
    %c0_i32_0 = arith.constant 0 : i32
    return %arg0, %c0_i32, %arg1, %arg2 : i32, i32, i32, i32
  }
  func.func @transform_1(%arg0: i32, %arg1: i32, %arg2: i32) -> (i32, i32) {
    %c0_i32 = arith.constant 0 : i32
    %c0_i32_0 = arith.constant 0 : i32
    %c0_i32_1 = arith.constant 0 : i32
    return %c0_i32, %c0_i32_0 : i32, i32
  }
  func.func @transform_2(%arg0: i32, %arg1: i32, %arg2: i32) -> (i32, i32) {
    %c0_i32 = arith.constant 0 : i32
    %c0_i32_0 = arith.constant 0 : i32
    %c0_i32_1 = arith.constant 0 : i32
    return %c0_i32, %c0_i32_0 : i32, i32
  }
  func.func @transform_3(%arg0: i32, %arg1: i32, %arg2: i32) -> (i32, i32) {
    %c0_i32 = arith.constant 0 : i32
    %c0_i32_0 = arith.constant 0 : i32
    %c0_i32_1 = arith.constant 0 : i32
    return %c0_i32, %c0_i32_0 : i32, i32
  }
  func.func @transform_4(%arg0: i32, %arg1: i32, %arg2: i32) -> (i32, i32) {
    %c0_i32 = arith.constant 0 : i32
    %c0_i32_0 = arith.constant 0 : i32
    %c0_i32_1 = arith.constant 0 : i32
    return %c0_i32, %c0_i32_0 : i32, i32
  }
  func.func @transform_5(%arg0: i32, %arg1: i32, %arg2: i32) -> (i32, i32) {
    %c0_i32 = arith.constant 0 : i32
    %c0_i32_0 = arith.constant 0 : i32
    %c0_i32_1 = arith.constant 0 : i32
    return %c0_i32, %c0_i32_0 : i32, i32
  }
  func.func @transform_6(%arg0: i32, %arg1: i32, %arg2: i32) -> (i32, i32) {
    %c0_i32 = arith.constant 0 : i32
    %c0_i32_0 = arith.constant 0 : i32
    %c0_i32_1 = arith.constant 0 : i32
    return %c0_i32, %c0_i32_0 : i32, i32
  }
  func.func @transform_7(%arg0: i32, %arg1: i32, %arg2: i32) -> (i32, i32) {
    %c0_i32 = arith.constant 0 : i32
    %c0_i32_0 = arith.constant 0 : i32
    %c0_i32_1 = arith.constant 0 : i32
    return %c0_i32, %c0_i32_0 : i32, i32
  }
  func.func @transform_8(%arg0: i32, %arg1: i32, %arg2: i32) -> (i32, i32) {
    %c0_i32 = arith.constant 0 : i32
    %c0_i32_0 = arith.constant 0 : i32
    %c0_i32_1 = arith.constant 0 : i32
    return %c0_i32, %c0_i32_0 : i32, i32
  }
  func.func @transform_9(%arg0: i32, %arg1: i32, %arg2: i32) -> (i32, i32) {
    %c0_i32 = arith.constant 0 : i32
    %c0_i32_0 = arith.constant 0 : i32
    %c0_i32_1 = arith.constant 0 : i32
    return %c0_i32, %c0_i32_0 : i32, i32
  }
  func.func @transform_10(%arg0: i32, %arg1: i32, %arg2: i32) -> (i32, i32) {
    %c0_i32 = arith.constant 0 : i32
    %c0_i32_0 = arith.constant 0 : i32
    %c0_i32_1 = arith.constant 0 : i32
    return %c0_i32, %c0_i32_0 : i32, i32
  }
  func.func @transform_11(%arg0: i32, %arg1: i32, %arg2: i32) -> (i32, i32) {
    %c0_i32 = arith.constant 0 : i32
    %c0_i32_0 = arith.constant 0 : i32
    %c0_i32_1 = arith.constant 0 : i32
    return %c0_i32, %c0_i32_0 : i32, i32
  }
  func.func @transform_12(%arg0: i32, %arg1: i32, %arg2: i32) -> (i32, i32) {
    %c0_i32 = arith.constant 0 : i32
    %c0_i32_0 = arith.constant 0 : i32
    %c0_i32_1 = arith.constant 0 : i32
    return %c0_i32, %c0_i32_0 : i32, i32
  }
  func.func @transform_13(%arg0: i32, %arg1: i32, %arg2: i32) -> (i32, i32, i32, i32) {
    %c0_i32 = arith.constant 0 : i32
    %c0_i32_0 = arith.constant 0 : i32
    return %arg0, %c0_i32, %arg1, %arg2 : i32, i32, i32, i32
  }
}

</mosaic_0001>

<bundles_post_ra>
// kernel: diff_jpeg_forward.1
= control target key start
LH: loop header
LB: loop body
LE: loop exit
PB: predicated region body
PF: predicated region fallthrough
CT: control target
= control target key end

     0   :  { %s2461_s0 = inlined_call_operand.hbm [shape: f32[2,3,16,16], index: 0, kind: input, shape index: {}]   ;;  %s2462_s1 = inlined_call_operand.hbm [shape: f32[16,16], index: 1, kind: input, shape index: {}, may-alias: {1,4}]   ;;  %s2463_s2 = inlined_call_operand.hbm [shape: f32[16,16], index: 2, kind: input, shape index: {}, may-alias: {2,3}]   ;;  %s2464_s3 = inlined_call_operand.hbm [shape: f32[16,16], index: 3, kind: input, shape index: {}, may-alias: {2,3}]   ;;  %s2465_s4 = inlined_call_operand.hbm [shape: f32[16,16], index: 4, kind: input, shape index: {}, may-alias: {1,4}]   ;;  %s2466_s5 = inlined_call_operand.hbm [shape: f32[8,16], index: 5, kind: input, shape index: {}]   ;;  %s2467_s6 = inlined_call_operand.hbm [shape: f32[16,8], index: 6, kind: input, shape index: {}]   ;;  %s2468_s7 = inlined_call_operand.hbm [shape: f32[16,8], index: 7, kind: input, shape index: {}]   ;;  %s2469_s8 = inlined_call_operand.hbm [shape: f32[8,16], index: 8, kind: input, shape index: {}]   ;;  %s2470_s9 = inlined_call_operand.hbm [shape: f32[16,16], index: 9, kind: input, shape index: {}]   ;;  %s2471_s10 = inlined_call_operand.hbm [shape: f32[16,16], index: 10, kind: input, shape index: {}]   ;;  %s2472_s11 = inlined_call_operand.hbm [shape: f32[8,8], index: 11, kind: input, shape index: {}]   ;;  %s2473_s12 = inlined_call_operand.vmem [shape: f32[8,8], index: 12, kind: input, shape index: {}]   ;;  %s2474_s13 = inlined_call_operand.hbm [shape: f32[2,3,16,16], index: 13, kind: output, shape index: {}]  }
   0x1   :  { %2480 = sst [smem:[#allocation33_spill]] %s2462_s1 }
   0x2   :  { %2481 = sst [smem:[#allocation34_spill]] %s2463_s2 }
   0x3   :  { %2482 = sst [smem:[#allocation35_spill]] %s2464_s3 }
   0x4   :  { %2483 = sst [smem:[#allocation36_spill]] %s2465_s4 }
   0x5   :  { %2484 = sst [smem:[#allocation37_spill]] %s2466_s5 }
   0x6   :  { %2485 = sst [smem:[#allocation38_spill]] %s2467_s6 }
   0x7   :  { %2486 = sst [smem:[#allocation39_spill]] %s2473_s12 }
   0x8   :  { %2487 = sst [smem:[#allocation40_spill]] %s2474_s13 }
   0x9   :  { %18 = vsyncpa [#allocation3], 0 }
   0xa   :  { %20 = vsyncpa [#allocation3 + $0x1], 0 }
   0xb   :  { %21 = vsyncpa [#allocation6], 0 }
   0xc   :  { %22 = vsyncpa [#allocation9], 0 }
   0xd   :  { %23 = vsyncpa [#allocation12], 0 }
   0xe   :  { %24 = vsyncpa [#allocation15], 0 }
   0xf   :  { %25 = vsyncpa [#allocation18], 0 }
  0x10   :  { %26 = vsyncpa [#allocation21], 0 }
  0x11   :  { %27 = vsyncpa [#allocation4], 0 }
  0x12   :  { %29 = vsyncpa [#allocation4 + $0x1], 0  ;;  %s2169_s25 = smov 0   ;;  %s2171_s26 = smov 0  }
  0x13   :  { %s2173_s27 = smov 0   ;;  %s2175_s28 = smov 0  }
  0x14   :  { %s2177_s29 = smov 0   ;;  %s2179_s30 = smov 0  }
  0x15 LB: > { %2488 = sst [smem:[#allocation31_spill]] %s2074_s28  ;;  %s2475_s14 = sadd.s32 4294967295, %s2082_s30   ;;  %s2082_s30 = sphi %s2179_s30, %s35_s30   ;;  %s2078_s29 = sphi %s2177_s29, %s2514_s29   ;;  %s2074_s28 = sphi %s2175_s28, %s2513_s28   ;;  %s2070_s27 = sphi %s2173_s27, %s2512_s27   ;;  %s2066_s26 = sphi %s2171_s26, %s2511_s26   ;;  %s2062_s25 = sphi %s2169_s25, %s2510_s25  }
  0x16   : > { %p1340_p0 = scmp.ge.s32.totalorder %s2082_s30, 1  ;;  %p2203_p1 = scmp.eq.s32.totalorder %s2475_s14, 0 }
  0x17   : > { %p371_p2 = scmp.lt.s32.totalorder %s2082_s30, 3  ;;  %s2490_s1 = sld [smem:[#allocation33_spill]] }
  0x18   : > { %s2084_s20 = smov [#allocation5]   ;;  %p1352_p6 = scmp.ge.s32.totalorder %s2082_s30, 2 }
  0x19   : > { %p2211_p3 = pnand %p1340_p0, %p371_p2  ;;  %s384_s21 = sshll.u32 %s2084_s20, 4  ;;  %s385_s21 = int_to_ptr.vmem [resolvable:$true] %s384_s21 }
  0x1a   : > { %s2494_s3 = sld [smem:[#allocation35_spill]]  ;;  %s2478_s17 = smov 128  }
  0x1b   : > { %s2491_s19 = scalar_select %p2211_p3, 1, 0 }
  0x1c   : > { %p1487_p4 = pneg %p2211_p3  ;;  %s2479_s14 = smov 8  }
  0x1d   : > { %s382_s18 = sshll.u32 %s2490_s1, 4  ;;  %2492 = sst [smem:[#allocation32_spill]] %s2491_s19  ;;  %s383_s18 = int_to_ptr.hbm [resolvable:$true] %s382_s18 }
  0x1e   : > { %p2219_p5 = pnand %p1487_p4, %p2203_p1  ;;  %s2087_s20 = smov [#allocation8]  }
  0x1f   : > { %s412_s1 = sshll.u32 %s2087_s20, 4  ;;  %s2495_s5 = sld [smem:[#allocation37_spill]]  ;;  %s413_s1 = int_to_ptr.vmem [resolvable:$true] %s412_s1 }
  0x20   : > { %s410_s16 = sshll.u32 %s2494_s3, 4  ;;  %s464_s3 = sshll.u32 %s2468_s7, 4  ;;  %s411_s16 = int_to_ptr.hbm [resolvable:$true] %s410_s16  ;;  %s465_s3 = int_to_ptr.hbm [resolvable:$true] %s464_s3 }
  0x21   : > { %1490 = dma.hbm_to_vmem [thread:$0]  (!%p2219_p5), %s383_s18, 256, %s385_s21, [#allocation6], %s2478_s17, %s2478_s17, %s2479_s14  }
  0x22   : > { %1496 = dma.hbm_to_vmem [thread:$0]  (!%p2219_p5), %s411_s16, 256, %s413_s1, [#allocation9], %s2478_s17, %s2478_s17, %s2479_s14  }
  0x23   : > { %s2088_s19 = smov [#allocation11]   ;;  %s2089_s13 = smov [#allocation14]  }
  0x24   : > { %s441_s18 = sshll.u32 %s2088_s19, 4  ;;  %s466_s28 = sshll.u32 %s2089_s13, 4  ;;  %s442_s18 = int_to_ptr.vmem [resolvable:$true] %s441_s18  ;;  %s467_s28 = int_to_ptr.vmem [resolvable:$true] %s466_s28 }
  0x25   : > { %s439_s12 = sshll.u32 %s2495_s5, 4  ;;  %s490_s5 = sshll.u32 %s2470_s9, 4  ;;  %s440_s12 = int_to_ptr.hbm [resolvable:$true] %s439_s12  ;;  %s491_s5 = int_to_ptr.hbm [resolvable:$true] %s490_s5 }
  0x26   : > { %1502 = dma.hbm_to_vmem [thread:$0]  (!%p2219_p5), %s440_s12, 128, %s442_s18, [#allocation12]  }
  0x27   : > { %1508 = dma.hbm_to_vmem [thread:$0]  (!%p2219_p5), %s465_s3, 256, %s467_s28, [#allocation15], %s2478_s17, %s2478_s17, %s2479_s14  }
  0x28   : > { %s2496_s2 = sld [smem:[#allocation34_spill]]  ;;  %s2090_s23 = smov [#allocation17]  }
  0x29   : > { %s492_s12 = sshll.u32 %s2090_s23, 4  ;;  %s2091_s24 = smov [#allocation7]   ;;  %s493_s12 = int_to_ptr.vmem [resolvable:$true] %s492_s12 }
  0x2a   : > { %1514 = dma.hbm_to_vmem [thread:$0]  (!%p2219_p5), %s491_s5, 256, %s493_s12, [#allocation18], %s2478_s17, %s2478_s17, %s2479_s14  }
  0x2b   : > { %s398_s18 = sshll.u32 %s2091_s24, 4  ;;  %s2497_s4 = sld [smem:[#allocation36_spill]]  ;;  %s399_s18 = int_to_ptr.vmem [resolvable:$true] %s398_s18 }
  0x2c   : > { %s2498_s6 = sld [smem:[#allocation38_spill]]  ;;  %s2092_s19 = smov [#allocation10]  }
  0x2d   : > { %s426_s5 = sshll.u32 %s2092_s19, 4  ;;  %s2093_s23 = smov [#allocation13]   ;;  %s427_s5 = int_to_ptr.vmem [resolvable:$true] %s426_s5 }
  0x2e   : > { %s396_s16 = sshll.u32 %s2496_s2, 4  ;;  %s452_s12 = sshll.u32 %s2093_s23, 4  ;;  %s397_s16 = int_to_ptr.hbm [resolvable:$true] %s396_s16  ;;  %s453_s12 = int_to_ptr.vmem [resolvable:$true] %s452_s12 }
  0x2f   : > { %1493 = dma.hbm_to_vmem [thread:$0]  (!%p2219_p5), %s397_s16, 256, %s399_s18, [#allocation6], %s2478_s17, %s2478_s17, %s2479_s14  }
  0x30   : > { %s479_s16 = sshll.u32 %s2469_s8, 4  ;;  %s504_s28 = sshll.u32 %s2471_s10, 4  ;;  %s480_s16 = int_to_ptr.hbm [resolvable:$true] %s479_s16  ;;  %s505_s28 = int_to_ptr.hbm [resolvable:$true] %s504_s28 }
  0x31   : > { %s424_s3 = sshll.u32 %s2497_s4, 4  ;;  %s2095_s19 = smov [#allocation19]   ;;  %s425_s3 = int_to_ptr.hbm [resolvable:$true] %s424_s3 }
  0x32   : > { %s450_s1 = sshll.u32 %s2498_s6, 4  ;;  %s2096_s24 = smov [#allocation20]   ;;  %s451_s1 = int_to_ptr.hbm [resolvable:$true] %s450_s1 }
  0x33   : > { %1499 = dma.hbm_to_vmem [thread:$0]  (!%p2219_p5), %s425_s3, 256, %s427_s5, [#allocation9], %s2478_s17, %s2478_s17, %s2479_s14  }
  0x34   : > { %1505 = dma.hbm_to_vmem [thread:$0]  (!%p2219_p5), %s451_s1, 256, %s453_s12, [#allocation12], %s2478_s17, %s2478_s17, %s2479_s14  }
  0x35   : > { %s2094_s3 = smov [#allocation16]   ;;  %s506_s1 = sshll.u32 %s2095_s19, 4  ;;  %s507_s1 = int_to_ptr.vmem [resolvable:$true] %s506_s1 }
  0x36   : > { %s481_s20 = sshll.u32 %s2094_s3, 4  ;;  %s519_s12 = sshll.u32 %s2472_s11, 4  ;;  %s482_s20 = int_to_ptr.vmem [resolvable:$true] %s481_s20  ;;  %s520_s12 = int_to_ptr.hbm [resolvable:$true] %s519_s12 }
  0x37   : > { %1511 = dma.hbm_to_vmem [thread:$0]  (!%p2219_p5), %s480_s16, 128, %s482_s20, [#allocation15]  }
  0x38   : > { %1517 = dma.hbm_to_vmem [thread:$0]  (!%p2219_p5), %s505_s28, 256, %s507_s1, [#allocation18], %s2478_s17, %s2478_s17, %s2479_s14  }
  0x39   : > { %s521_s13 = sshll.u32 %s2096_s24, 4  ;;  %s1339_s16 = sadd.s32 4294967294, %s2082_s30   ;;  %s522_s13 = int_to_ptr.vmem [resolvable:$true] %s521_s13 }
  0x3a   : > { %1520 = dma.hbm_to_vmem [thread:$0]  (!%p2219_p5), %s520_s12, 128, %s522_s13, [#allocation21]  }
  0x3b   : > { %s54_s18 = sadd.s32 1, %s2078_s29  ;;  %s65_s21 = sadd.s32 1, %s2070_s27 }
  0x3c   : > { %p56_p7 = scmp.ge.s32.totalorder %s54_s18, 2  ;;  %p72_p8 = scmp.ne.s32.totalorder %s2070_s27, %s2066_s26 }
  0x3d   : > { %p73_p9 = scmp.eq.s32.totalorder %s2082_s30, 0  ;;  %p78_p10 = scmp.ne.s32.totalorder %s2066_s26, %s2062_s25 }
  0x3e   : > { %s2516_s18 = smov (%p56_p7, %s54_s18), 0  ;;  %s2501_s20 = sadd.s32 4294967295, %s2082_s30  }
  0x3f   : > { %p2310_p11 = por %p73_p9, %p72_p8  ;;  %p2316_p12 = por %p2203_p1, %p78_p10 }
  0x40   : > { %s58_s3 = ssub.s32 %s2078_s29, %s2516_s18  ;;  %p358_p13 = scmp.eq.s32.totalorder %s2501_s20, 1 }
  0x41   : > { %p63_p0 = scmp.eq.s32.totalorder %s58_s3, 0  ;;  %p364_p2 = scmp.eq.s32.totalorder %s1339_s16, 1 }
  0x42   : > { %p2324_p4 = por %p358_p13, %p72_p8  ;;  %p1540_p5 = scmp.lt.s32.totalorder %s2082_s30, 2 }
  0x43   : > { %s2330_s1 = scalar_select %p63_p0, %s2070_s27, %s65_s21  }
  0x44   : > { %p2332_p7 = por %p364_p2, %p78_p10  ;;  %s535_s23 = sand.u32 1, %s2070_s27  }
  0x45   : > { %s1403_s12 = smul.u32 48, %s535_s23  ;;  %p1522_p9 = pnand %p1540_p5, %p2310_p11 }
  0x46   : > { %s1404_s24 = smul.u32 48, %s2078_s29  ;;  %s536_s21 = scalar_lea.sflag [#allocation3], %s535_s23 }
  0x47   : > { %s539_s3 = scalar_lea.vmem [#allocation2], %s1403_s12  ;;  %s2504_s2 = smov 8  }
  0x48   : > { %s547_s16 = scalar_lea.hbm %s2461_s0, %s1404_s24  ;;  %s550_s17 = sshll.u32 %s539_s3, 4  ;;  %s551_s17 = int_to_ptr.vmem [resolvable:$true] %s550_s17 }
  0x49   : > { %s548_s14 = sshll.u32 %s547_s16, 4  ;;  %s2505_s4 = smov 128   ;;  %s549_s14 = int_to_ptr.hbm [resolvable:$true] %s548_s14 }
  0x4a   : > { %1524 = dma.hbm_to_vmem [thread:$0]  (!%p1522_p9), %s549_s14, 768, %s551_s17, %s536_s21, %s2505_s4, %s2505_s4, %s2504_s2  }
  0x4b   : > { %562 = sbr.rel (%p2211_p3) target bundleno = 699 (0x2bb), region = 72  ;;  %s2349_s28 = sand.u32 (!%p2211_p3), 1, %s2066_s26  }
  0x4c   : > { %s1405_s12 = smul.u32 (!%p2211_p3), 48, %s2349_s28  ;;  %s565_s24 = scalar_lea.sflag (!%p2211_p3), [#allocation3], %s2349_s28 }
  0x4e   : > { %s568_s13 = scalar_lea.vmem (!%p2211_p3), [#allocation2], %s1405_s12 }
  0x50   : > { %2029 = dma.done.wait (%p2316_p12), %s565_s24, 768  }
  0x51   : > { %2031 = vsyncadd (%p2316_p12), %s565_s24, 4294966528 }
  0x52   : > { %2033 = dma.done.wait (%p2203_p1), [#allocation6], 512  }
  0x53   : > { %2035 = vsyncadd (%p2203_p1), [#allocation6], 4294966784 }
  0x54   : > { %2037 = dma.done.wait (%p2203_p1), [#allocation9], 512  }
  0x55   : > { %2039 = vsyncadd (%p2203_p1), [#allocation9], 4294966784 }
  0x56   : > { %2041 = dma.done.wait (%p2203_p1), [#allocation12], 384  }
  0x57   : > { %2043 = vsyncadd (%p2203_p1), [#allocation12], 4294966912 }
  0x58   : > { %2045 = dma.done.wait (%p2203_p1), [#allocation15], 384  }
  0x59   : > { %2047 = vsyncadd (%p2203_p1), [#allocation15], 4294966912 }
  0x5a   : > { %2049 = dma.done.wait (%p2203_p1), [#allocation18], 512  }
  0x5b   : > { %2051 = vsyncadd (%p2203_p1), [#allocation18], 4294966784 }
  0x5c   : > { %2053 = dma.done.wait (%p2203_p1), [#allocation21], 128  }
  0x5d   : > { %2055 = vsyncadd (%p2203_p1), [#allocation21], 4294967168  ;;  %v670_v0 = vld [vmem:[%s568_s13 + $0x8] sm:$0xff]  ;;  %v1367_v1 = vld [vmem:[%s568_s13 + $0x18] sm:$0xff]  ;;  %vm717_vm0 = vcmask 130048   ;;  %s2507_s6 = sld [smem:[#allocation39_spill]] }
  0x5e   : > { %v1369_v2 = vld [vmem:[%s568_s13 + $0x28] sm:$0xff]  ;;  %v672_v3 = vmul.f32 255.0, %v670_v0  ;;  %v677_v4 = vmul.f32 255.0, %v1367_v1  ;;  %v669_v6 = vld [vmem:[%s568_s13] sm:$0xff]  ;;  %v1366_v7 = vld [vmem:[%s568_s13 + $0x10] sm:$0xff]  ;;  %vm918_vm5 = vcmask 64512  }
  0x5f   : > { %v682_v5 = vmul.f32 255.0, %v1369_v2  ;;  %v1368_v8 = vld [vmem:[%s568_s13 + $0x20] sm:$0xff]  ;;  %v671_v9 = vmul.f32 255.0, %v669_v6  ;;  %v676_v10 = vmul.f32 255.0, %v1366_v7  ;;  %v748_v21 = vld [vmem:[#allocation8 + $0x8] sm:$0xff]  ;;  %v779_v2 = vld [vmem:[#allocation17 + $0x8] sm:$0xff] }
  0x60   : > { %v681_v11 = vmul.f32 255.0, %v1368_v8  ;;  %v684_v12 = vmul.f32 0.299, %v672_v3  ;;  %v686_v13 = vmul.f32 0.587, %v677_v4  ;;  %769 = vmatpush.msra.mxu1 %v748_v21  ;;  %1401 = vmatpush.msra.mxu3 %v748_v21  ;;  %v704_v28 = vmul.f32 0.5, %v672_v3 }
  0x61   : > { %v690_v14 = vmul.f32 0.114, %v682_v5  ;;  %v683_v15 = vmul.f32 0.299, %v671_v9  ;;  %v685_v16 = vmul.f32 0.587, %v676_v10 }
  0x62   : > { %v689_v17 = vmul.f32 0.114, %v681_v11  ;;  %v688_v18 = vadd.f32 %v686_v13, %v684_v12  ;;  %v694_v19 = vmul.f32 -0.168736, %v672_v3  ;;  %v696_v20 = vmul.f32 0.331264, %v677_v4 }
  0x63   : > { %v687_v22 = vadd.f32 %v685_v16, %v683_v15  ;;  %v700_v23 = vmul.f32 0.5, %v682_v5  ;;  %v693_v24 = vmul.f32 -0.168736, %v671_v9  ;;  %v695_v25 = vmul.f32 0.331264, %v676_v10  ;;  %v713_v39 = vld [vmem:[#allocation5] sm:$0xff] }
  0x64   : > { %v692_v26 = vadd.f32 %v690_v14, %v688_v18  ;;  %v698_v27 = vsub.f32 %v694_v19, %v696_v20  ;;  %v706_v29 = vmul.f32 0.418688, %v677_v4  ;;  %v703_v31 = vmul.f32 0.5, %v671_v9  ;;  %v714_v40 = vld [vmem:[#allocation5 + $0x8] sm:$0xff]  ;;  %v858_v47 = vld [vmem:[#allocation11] sm:$0xff]  ;;  %v883_v49 = vld [vmem:[#allocation13 + $0x8] sm:$0xff] }
  0x65   : > { %v691_v30 = vadd.f32 %v689_v17, %v687_v22  ;;  %v697_v33 = vsub.f32 %v693_v24, %v695_v25  ;;  %v699_v34 = vmul.f32 0.5, %v681_v11  ;;  %v705_v35 = vmul.f32 0.418688, %v676_v10  ;;  %v747_v48 = vld [vmem:[#allocation8] sm:$0xff]  ;;  %v882_v50 = vld [vmem:[#allocation13] sm:$0xff]  ;;  %v778_v55 = vld [vmem:[#allocation17] sm:$0xff] }
  0x66   : > { %v1371_v32 = vadd.f32 -128.0, %v692_v26  ;;  %v708_v37 = vsub.f32 %v704_v28, %v706_v29  ;;  %v710_v38 = vmul.f32 0.081312, %v682_v5  ;;  %v702_v41 = vadd.f32 %v700_v23, %v698_v27  ;;  %770 = vmatpush.msra.mxu1 %v747_v48  ;;  %1402 = vmatpush.msra.mxu3 %v747_v48  ;;  %v907_v60 = vld [vmem:[#allocation20] sm:$0xff]  ;;  %s2408_s14 = scalar_lea.vmem [#allocation22], %s1405_s12  ;;  %s2508_s15 = sld [smem:[#allocation31_spill]] }
  0x67   : > { %v1370_v36 = vadd.f32 -128.0, %v691_v30  ;;  %v707_v42 = vsub.f32 %v703_v31, %v705_v35  ;;  %v709_v43 = vmul.f32 0.081312, %v681_v11  ;;  %v701_v44 = vadd.f32 %v699_v34, %v697_v33  ;;  %s2509_s20 = sld [smem:[#allocation40_spill]]  ;;  %s1138_s3 = sshll.u32 %s2408_s14, 4  ;;  %s1139_s3 = int_to_ptr.vmem [resolvable:$true] %s1138_s3 }
  0x68   : > { %738 = vmatpush.msra.mxu0 %v1371_v32  ;;  %1399 = vmatpush.msra.mxu2 %v1371_v32  ;;  %v712_v45 = vsub.f32 %v708_v37, %v710_v38  ;;  %s1123_s12 = scalar_lea.sflag [#allocation4], %s2349_s28 }
  0x69   : > { %v711_v46 = vsub.f32 %v707_v42, %v709_v43  ;;  %901 = vmatpush.msrb.mxu1 %v883_v49 }
  0x6a   : > { %739 = vmatpush.msra.mxu0 %v1370_v36  ;;  %1400 = vmatpush.msra.mxu2 %v1370_v36 }
  0x6b   : > { %1372 = vmatmul.msk.f32.vlgmr.msra.gmra.mxu0 %vm717_vm0, %v713_v39  ;;  %1373 = vmatmul.msk.f32.vlgmr.msra.gmra.mxu2 %vm717_vm0, %v714_v40  ;;  %v781_v40 = vld [vmem:[#allocation19 + $0x8] sm:$0xff] }
  0x6c   : > { %876 = vmatpush.msrb.mxu0 %v702_v41  ;;  %902 = vmatpush.msrb.mxu1 %v882_v50  ;;  %v828_v41 = vld [vmem:[#allocation10 + $0x8] sm:$0xff]  ;;  %s1438_s17 = smul.u32 48, %s2508_s15 }
  0x6d   : > { %849 = vmatpush.msrb.mxu3 %v828_v41 }
  0x6e   : > { %877 = vmatpush.msrb.mxu0 %v701_v44  ;;  %s1137_s16 = scalar_lea.hbm %s2509_s20, %s1438_s17 }
  0x6f   : > { %s1140_s21 = sshll.u32 %s1137_s16, 4  ;;  %s1141_s21 = int_to_ptr.hbm [resolvable:$true] %s1140_s21 }
  0x70   : > { %992 = vmatpush.msra.mxu0 %v712_v45  ;;  %s1990_s24 = sshra.s32 %s1141_s21, 4  ;;  %s1991_s24 = int_to_ptr.hbm [resolvable:$true] %s1990_s24 }
  0x71   : > { %s1992_s13 = scalar_lea.hbm %s1991_s24, 48  ;;  %p1997_p10 = scmp.lt.s32.totalorder %s1991_s24, %s2509_s20 }
  0x72   : > { %993 = vmatpush.msra.mxu0 %v711_v46  ;;  %v780_v46 = vld [vmem:[#allocation19] sm:$0xff]  ;;  %p1993_p1 = scmp.ne.s32.totalorder %s1991_s24, %s1992_s13 }
  0x73   : > { %1380 = vmatmul.msk.f32.vlgmr.msrb.gmra.mxu0 %vm717_vm0, %v858_v47 }
  0x74   : > { %p1994_p3 = pnand %p1993_p1, %p2324_p4 }
  0x76   : > { %p1995_p8 = pneg %p1994_p3 }
  0x7b   : > { %1386 = vmatmul.msk.f32.vlgmr.msra.gmra.mxu0 %vm717_vm0, %v858_v47  ;;  %v908_v47 = vld [vmem:[%s2507_s6] sm:$0xff]  ;;  %s1996_s6 = scalar_lea.hbm %s2509_s20, 96 }
  0x7c   : > { %p1998_p11 = scmp.lt.s32.totalorder %s1996_s6, %s1992_s13 }
  0x7e   : > { %p1999_p12 = por %p1998_p11, %p1997_p10 }
  0x80   : > { %p2000_p13 = pnand %p1999_p12, %p1995_p8 }
  0xe8   : > { %v741_v51 = vpop.f32.mrf.mxu0 }
  0xe9   : > { %1374 = vmatmul.msk.f32.vlgmr.msra.gmra.mxu1 %vm717_vm0, %v741_v51  ;;  %v796_v51 = vld [vmem:[#allocation7] sm:$0xff] }
  0xea   : > { %1015 = vmatpush.msra.mxu1 %v883_v49 }
  0xec   : > { %1016 = vmatpush.msra.mxu1 %v882_v50 }
  0xee   : > { %v744_v52 = vpop.f32.mrf.mxu2 }
  0xef   : > { %1375 = vmatmul.msk.f32.vlgmr.msra.gmra.mxu3 %vm717_vm0, %v744_v52 }
  0xf0   : > { %v879_v53 = vpop.f32.mrf.mxu0 }
  0xf1   : > { %1381 = vmatmul.msk.f32.vlgmr.msrb.gmra.mxu1 %vm717_vm0, %v879_v53 }
  0xf8   : > { %v995_v54 = vpop.f32.mrf.mxu0 }
  0xf9   : > { %1387 = vmatmul.msk.f32.vlgmr.msra.gmra.mxu1 %vm717_vm0, %v995_v54 }
 0x166   : > { %v772_v56 = vpop.f32.mrf.mxu1 }
 0x167   : > { %v782_v57 = vmul.f32 %v778_v55, %v772_v56  ;;  %v916_v55 = vld [vmem:[#allocation14] sm:$0xff] }
 0x168   : > { %v797_v56 = vld [vmem:[#allocation7 + $0x8] sm:$0xff] }
 0x169   : > { %v1408_v58 = vcvt.f32.s32 %v782_v57  ;;  %v1411_v62 = vand.u32 2147483648, %v782_v57  ;;  %v1406_v0 = vand.u32 2147483647, %v782_v57 }
 0x16b   : > { %v1409_v59 = vcvt.s32.f32 %v1408_v58  ;;  %vm1407_vm1 = vcmp.lt.f32.partialorder %v1406_v0, 8388608.0  ;;  %v827_v58 = vld [vmem:[#allocation10] sm:$0xff] }
 0x16c   : > { %850 = vmatpush.msrb.mxu3 %v827_v58 }
 0x16d   : > { %v1410_v61 = vand.u32 2147483647, %v1409_v59  ;;  %v948_v59 = vld [vmem:[#allocation16] sm:$0xff] }
 0x16e   : > { %v904_v63 = vpop.f32.mrf.mxu1  ;;  %970 = vmatpush.msra.mxu3 %v948_v59  ;;  %1072 = vmatpush.msrb.mxu1 %v948_v59 }
 0x16f   : > { %v909_v1 = vmul.f32 %v907_v60, %v904_v63  ;;  %v1412_v4 = vor.u32 %v1411_v62, %v1410_v61 }
 0x171   : > { %v1424_v3 = vcvt.f32.s32 %v909_v1  ;;  %v1422_v6 = vand.u32 2147483647, %v909_v1  ;;  %v1427_v8 = vand.u32 2147483648, %v909_v1  ;;  %v1413_v12 = vsel %vm1407_vm1, %v1412_v4, %v782_v57 }
 0x172   : > { %v775_v5 = vpop.f32.mrf.mxu3  ;;  %v786_v18 = vsub.f32 %v782_v57, %v1413_v12  ;;  %v917_v57 = vld [vmem:[#allocation14 + $0x8] sm:$0xff] }
 0x173   : > { %v1425_v7 = vcvt.s32.f32 %v1424_v3  ;;  %v783_v9 = vmul.f32 %v779_v2, %v775_v5  ;;  %vm1423_vm2 = vcmp.lt.f32.partialorder %v1422_v6, 8388608.0 }
 0x174   : > { %v788_v28 = vmul.f32 %v786_v18, %v786_v18 }
 0x175   : > { %v1426_v10 = vand.u32 2147483647, %v1425_v7  ;;  %v1416_v11 = vcvt.f32.s32 %v783_v9  ;;  %v1414_v17 = vand.u32 2147483647, %v783_v9  ;;  %v1419_v21 = vand.u32 2147483648, %v783_v9 }
 0x176   : > { %v1018_v13 = vpop.f32.mrf.mxu1  ;;  %v790_v35 = vmul.f32 %v788_v28, %v786_v18 }
 0x177   : > { %v1021_v14 = vmul.f32 %v1018_v13, %v907_v60  ;;  %v1417_v15 = vcvt.s32.f32 %v1416_v11  ;;  %v1428_v16 = vor.u32 %v1427_v8, %v1426_v10  ;;  %vm1415_vm3 = vcmp.lt.f32.partialorder %v1414_v17, 8388608.0 }
 0x178   : > { %v792_v43 = vadd.f32 %v1413_v12, %v790_v35 }
 0x179   : > { %v1432_v19 = vcvt.f32.s32 %v1021_v14  ;;  %v1418_v20 = vand.u32 2147483647, %v1417_v15  ;;  %v1430_v22 = vand.u32 2147483647, %v1021_v14  ;;  %v1429_v23 = vsel %vm1423_vm2, %v1428_v16, %v909_v1 }
 0x17a   : > { %v1435_v25 = vand.u32 2147483648, %v1021_v14  ;;  %v911_v27 = vsub.f32 %v909_v1, %v1429_v23  ;;  %v794_v50 = vmul.f32 %v792_v43, %v780_v46 }
 0x17b   : > { %v1433_v24 = vcvt.s32.f32 %v1432_v19  ;;  %v1420_v26 = vor.u32 %v1419_v21, %v1418_v20  ;;  %vm1431_vm4 = vcmp.lt.f32.partialorder %v1430_v22, 8388608.0 }
 0x17c   : > { %v912_v31 = vmul.f32 %v911_v27, %v911_v27 }
 0x17d   : > { %v1434_v29 = vand.u32 2147483647, %v1433_v24  ;;  %v1421_v30 = vsel %vm1415_vm3, %v1420_v26, %v783_v9 }
 0x17e   : > { %v787_v32 = vsub.f32 %v783_v9, %v1421_v30  ;;  %v913_v36 = vmul.f32 %v912_v31, %v911_v27 }
 0x17f   : > { %v1436_v33 = vor.u32 %v1435_v25, %v1434_v29 }
 0x180   : > { %v789_v34 = vmul.f32 %v787_v32, %v787_v32  ;;  %v914_v44 = vadd.f32 %v1429_v23, %v913_v36 }
 0x181   : > { %v1437_v37 = vsel %vm1431_vm4, %v1436_v33, %v1021_v14 }
 0x182   : > { %v791_v38 = vmul.f32 %v789_v34, %v787_v32  ;;  %v1023_v39 = vsub.f32 %v1021_v14, %v1437_v37  ;;  %v915_v52 = vmul.f32 %v914_v44, %v908_v47 }
 0x184   : > { %v793_v42 = vadd.f32 %v1421_v30, %v791_v38  ;;  %v1024_v45 = vmul.f32 %v1023_v39, %v1023_v39 }
 0x186   : > { %v795_v48 = vmul.f32 %v793_v42, %v781_v40  ;;  %v1025_v49 = vmul.f32 %v1024_v45, %v1023_v39 }
 0x188   : > { %818 = vmatpush.msrb.mxu2 %v795_v48  ;;  %v1026_v53 = vadd.f32 %v1437_v37, %v1025_v49 }
 0x18a   : > { %819 = vmatpush.msrb.mxu2 %v794_v50  ;;  %v1027_v54 = vmul.f32 %v1026_v53, %v908_v47 }
 0x18b   : > { %1376 = vmatmul.msk.f32.vlgmr.msrb.gmra.mxu2 %vm717_vm0, %v796_v51 }
 0x18c   : > { %940 = vmatpush.msra.mxu2 %v915_v52  ;;  %1043 = vmatpush.msrb.mxu0 %v1027_v54 }
 0x18d   : > { %1388 = vmatmul.msk.f32.vlgmr.msrb.gmra.mxu0 %vm918_vm5, %v916_v55 }
 0x193   : > { %1377 = vmatmul.msk.f32.gmra.mxu2 %vm717_vm0, %v797_v56 }
 0x195   : > { %1389 = vmatmul.msk.f32.gmra.mxu0 %vm918_vm5, %v917_v57 }
 0x19b   : > { %1382 = vmatmul.msk.f32.vlgmr.msra.gmra.mxu2 %vm918_vm5, %v916_v55 }
 0x1a3   : > { %1383 = vmatmul.msk.f32.gmra.mxu2 %vm918_vm5, %v917_v57 }
 0x20a   : > { %v1045_v60 = vpop.f32.mrf.mxu0 }
 0x20b   : > { %1390 = vmatmul.msk.f32.vlgmr.msrb.gmra.mxu1 %vm918_vm5, %v1045_v60 }
 0x20e   : > { %v821_v61 = vpop.f32.mrf.mxu2 }
 0x20f   : > { %1378 = vmatmul.msk.f32.vlgmr.msrb.gmra.mxu3 %vm717_vm0, %v821_v61 }
 0x212   : > { %v1048_v62 = vpop.f32.mrf.mxu0 }
 0x213   : > { %1391 = vmatmul.msk.f32.gmra.mxu1 %vm918_vm5, %v1048_v62 }
 0x216   : > { %v824_v63 = vpop.f32.mrf.mxu2 }
 0x217   : > { %1379 = vmatmul.msk.f32.gmra.mxu3 %vm717_vm0, %v824_v63 }
 0x21e   : > { %v942_v0 = vpop.f32.mrf.mxu2 }
 0x21f   : > { %1384 = vmatmul.msk.f32.vlgmr.msra.gmra.mxu3 %vm918_vm5, %v942_v0 }
 0x226   : > { %v945_v1 = vpop.f32.mrf.mxu2 }
 0x227   : > { %1385 = vmatmul.msk.f32.gmra.mxu3 %vm918_vm5, %v945_v1 }
 0x288   : > { %v1074_v2 = vpop.f32.mrf.mxu1 }
 0x289   : > { %v1080_v3 = vmul.f32 1.402, %v1074_v2  ;;  %v1088_v17 = vmul.f32 0.714136, %v1074_v2 }
 0x290   : > { %v1077_v7 = vpop.f32.mrf.mxu1 }
 0x291   : > { %v1081_v10 = vmul.f32 1.402, %v1077_v7  ;;  %v1089_v28 = vmul.f32 0.714136, %v1077_v7 }
 0x292   : > { %v852_v4 = vpop.f32.mrf.mxu3 }
 0x293   : > { %v853_v5 = vadd.f32 128.0, %v852_v4 }
 0x295   : > { %v1082_v6 = vadd.f32 %v1080_v3, %v853_v5 }
 0x297   : > { %v1096_v8 = vmax.f32 %v1082_v6, 0.0 }
 0x299   : > { %v1098_v9 = vmin.f32 %v1096_v8, 255.0 }
 0x29a   : > { %v855_v11 = vpop.f32.mrf.mxu3 }
 0x29b   : > { %v1100_v12 = vmul.f32 0.003921569, %v1098_v9  ;;  %v856_v13 = vadd.f32 128.0, %v855_v11 }
 0x29d   : > { %1102 = vst.msk [vmem:[%s2408_s14] sm:$0xff] %vm717_vm0, %v1100_v12  ;;  %v1083_v14 = vadd.f32 %v1081_v10, %v856_v13 }
 0x29f   : > { %v1097_v15 = vmax.f32 %v1083_v14, 0.0 }
 0x2a1   : > { %v1099_v16 = vmin.f32 %v1097_v15, 255.0 }
 0x2a2   : > { %v972_v18 = vpop.f32.mrf.mxu3 }
 0x2a3   : > { %v1101_v19 = vmul.f32 0.003921569, %v1099_v16  ;;  %v1084_v20 = vmul.f32 0.344136, %v972_v18  ;;  %v1092_v21 = vmul.f32 1.772, %v972_v18 }
 0x2a5   : > { %1103 = vst.msk [vmem:[%s2408_s14 + $0x8] sm:$0xff] %vm717_vm0, %v1101_v19  ;;  %v1086_v22 = vsub.f32 %v853_v5, %v1084_v20  ;;  %v1094_v23 = vadd.f32 %v1092_v21, %v853_v5 }
 0x2a7   : > { %v1090_v24 = vsub.f32 %v1086_v22, %v1088_v17  ;;  %v1113_v25 = vmax.f32 %v1094_v23, 0.0 }
 0x2a9   : > { %v1104_v26 = vmax.f32 %v1090_v24, 0.0  ;;  %v1115_v27 = vmin.f32 %v1113_v25, 255.0 }
 0x2aa   : > { %v975_v29 = vpop.f32.mrf.mxu3 }
 0x2ab   : > { %v1106_v30 = vmin.f32 %v1104_v26, 255.0  ;;  %v1117_v31 = vmul.f32 0.003921569, %v1115_v27  ;;  %v1085_v32 = vmul.f32 0.344136, %v975_v29 }
 0x2ac   : > { %v1093_v33 = vmul.f32 1.772, %v975_v29 }
 0x2ad   : > { %v1108_v34 = vmul.f32 0.003921569, %v1106_v30  ;;  %1394 = vst.msk [vmem:[%s2408_s14 + $0x20] sm:$0xff] %vm717_vm0, %v1117_v31  ;;  %v1087_v35 = vsub.f32 %v856_v13, %v1085_v32 }
 0x2ae   : > { %v1095_v36 = vadd.f32 %v1093_v33, %v856_v13 }
 0x2af   : > { %1392 = vst.msk [vmem:[%s2408_s14 + $0x10] sm:$0xff] %vm717_vm0, %v1108_v34  ;;  %v1091_v37 = vsub.f32 %v1087_v35, %v1089_v28 }
 0x2b0   : > { %v1114_v38 = vmax.f32 %v1095_v36, 0.0 }
 0x2b1   : > { %v1105_v39 = vmax.f32 %v1091_v37, 0.0 }
 0x2b2   : > { %v1116_v40 = vmin.f32 %v1114_v38, 255.0 }
 0x2b3   : > { %v1107_v41 = vmin.f32 %v1105_v39, 255.0 }
 0x2b4   : > { %v1118_v42 = vmul.f32 0.003921569, %v1116_v40 }
 0x2b5   : > { %v1109_v43 = vmul.f32 0.003921569, %v1107_v41 }
 0x2b6   : > { %1395 = vst.msk [vmem:[%s2408_s14 + $0x28] sm:$0xff] %vm717_vm0, %v1118_v42 }
 0x2b7   : > { %1393 = vst.msk [vmem:[%s2408_s14 + $0x18] sm:$0xff] %vm717_vm0, %v1109_v43 }
 0x2b8   : > { %2003 = shalt.err (!%p2000_p13)
}
 0x2b9   : > { %s2097_s28 = smov 128   ;;  %s2098_s14 = smov 8  }
 0x2ba   : > { %1485 = dma.vmem_to_hbm [thread:$0]  (%p2324_p4), %s1139_s3, 768, %s1141_s21, %s1123_s12, %s2097_s28, %s2097_s28, %s2098_s14  }
 0x2bb PF: > { %s1155_s22 = sand.u32 1, %s2062_s25   ;;  %p1526_p0 = pnand %p1352_p6, %p2332_p7 }
 0x2bc   : > { %s1156_s23 = scalar_lea.sflag [#allocation4], %s1155_s22 }
 0x2bd   : > { %p1527_p2 = pneg %p1526_p0 }
 0x2bf   : > { %2057 = dma.done.wait (%p1527_p2), %s1156_s23, 768  }
 0x2c0   : > { %2059 = vsyncadd (%p1527_p2), %s1156_s23, 4294966528  ;;  %s35_s30 = sadd.s32 1, %s2082_s30   ;;  %s2510_s25 = smov %s2066_s26 }
 0x2c1   : > { %p32_p5 = scmp.ge.s32.totalorder %s35_s30, 4   ;;  %s2511_s26 = smov %s2070_s27 }
 0x2c2   : > { %s2512_s27 = smov %s2330_s1  ;;  %s2513_s28 = smov %s2078_s29 }
 0x2c3   : > { %s2514_s29 = smov %s2516_s18  ;;  %34 = sbr.rel (!%p32_p5) target bundleno = 21 (0x15), region = 165 }
 0x2c8   :  { %1162 = vsyncpa [#allocation3], 1 }
 0x2c9   :  { %1164 = vsyncpa [#allocation3 + $0x1], 1 }
 0x2ca   :  { %1165 = vsyncpa [#allocation6], 1 }
 0x2cb   :  { %1166 = vsyncpa [#allocation9], 1 }
 0x2cc   :  { %1167 = vsyncpa [#allocation12], 1 }
 0x2cd   :  { %1168 = vsyncpa [#allocation15], 1 }
 0x2ce   :  { %1169 = vsyncpa [#allocation18], 1 }
 0x2cf   :  { %1170 = vsyncpa [#allocation21], 1 }
 0x2d0   :  { %1171 = vsyncpa [#allocation4], 1 }
 0x2d1   :  { %1173 = vsyncpa [#allocation4 + $0x1], 1 }

</bundles_post_ra>
